<compile_context>
chip_gen: v7x
topology: tpu7x:2x2x1
jax: 0.10.0
libtpu: 0.0.40
codegen_flags: <defaults>
</compile_context>

<pallas_src>
import jax
import jax.numpy as jnp
from jax.experimental import pallas as pl
from jax.experimental.pallas import tpu as pltpu

C_PAD = 128  # lane-dense padded class dimension


def _nn_kernel(x_ref, w_ref, b_ref, o_ref):
    # x_ref: (TILE_N, D)    f32 activations in flattened-NCHW order
    # w_ref: (D, C_PAD)     bf16 folded W_eff = perm(W1^T) @ W2^T, cols zero-padded
    # b_ref: (1, C_PAD)     f32 folded bias, padded lanes = -1e30 (softmax mask)
    # o_ref: (TILE_N, C_PAD) bf16 softmax scores (padded lanes come out 0)
    x = x_ref[...].astype(jnp.bfloat16)  # VPU cast, hidden under x DMA
    y = jnp.dot(x, w_ref[...], preferred_element_type=jnp.float32) + b_ref[...]
    m = jnp.max(y, axis=-1, keepdims=True)
    e = jnp.exp(y - m)
    denom = jnp.sum(e, axis=-1, keepdims=True)
    o_ref[...] = (e * pl.reciprocal(denom, approx=True)).astype(o_ref.dtype)


def _round_up(x, m):
    return (x + m - 1) // m * m


def prepare_params(w1, b1, w2, b2, im_size):
    """One-time weight preprocessing (hoisted out of the per-call forward)."""
    C, H, W = im_size
    D = C * H * W
    n_classes = w1.shape[0]
    assert n_classes <= C_PAD, f"n_classes={n_classes} exceeds lane padding {C_PAD}"
    assert w1.shape == (n_classes, D)

    # Permute rows of W1^T so x can stream in native flattened-NCHW order:
    #   x_nchw @ w1_perm == x_nhwc @ w1.T   (matches permute(0,2,3,1)+flatten)
    perm = jnp.arange(D).reshape(H, W, C).transpose(2, 0, 1).reshape(D)
    w1_t = w1.T[perm, :]                    # (D, n_classes)

    # Fold the two linear layers (no nonlinearity between them => exact in f32).
    w_eff = w1_t @ w2.T                     # (D, n_classes)
    b_eff = b1 @ w2.T + b2                  # (n_classes,)

    # Zero-pad the class dim to a lane-dense 128; bake the softmax mask into
    # the bias so the kernel needs no iota/where (padded lanes -> exp() == 0).
    w_pad = jnp.zeros((D, C_PAD), jnp.bfloat16).at[:, :n_classes].set(
        w_eff.astype(jnp.bfloat16))
    b_pad = jnp.full((1, C_PAD), -1e30, jnp.float32).at[0, :n_classes].set(b_eff)
    return w_pad, b_pad, n_classes


def nn_forward(images_nchw, w_pad, b_pad, n_classes, *, tile_n=1024):
    """images_nchw: (N, C, H, W) float32.  Returns (N, n_classes) f32 softmax."""
    N, C, H, W = images_nchw.shape
    D = C * H * W

    # Free view (NCHW is contiguous); f32 streamed directly, cast in-kernel.
    x = images_nchw.reshape(N, D)

    # VMEM sizing: double-buffered f32 x tile is the dominant consumer.
    vmem_budget = 24 * 1024 * 1024                      # bytes for 2 f32 x tiles
    rows_cap = max(8, (vmem_budget // (2 * D * 4)) // 8 * 8)
    # Give both v7x TensorCores work when N is big enough (>= 2 grid steps).
    two_core_cap = _round_up(pl.cdiv(N, 2), 8)
    tile_n = max(8, min(tile_n, rows_cap, two_core_cap))

    grid = (pl.cdiv(N, tile_n),)   # no jnp.pad; Pallas masks the ragged tail tile

    cost = pl.CostEstimate(
        flops=2 * N * D * C_PAD,
        transcendentals=N * C_PAD,
        bytes_accessed=N * D * 4 + N * C_PAD * 2 + D * C_PAD * 2 + C_PAD * 4,
    )

    out = pl.pallas_call(
        _nn_kernel,
        out_shape=jax.ShapeDtypeStruct((N, C_PAD), jnp.bfloat16),
        grid=grid,
        in_specs=[
            pl.BlockSpec((tile_n, D), lambda i: (i, 0)),
            pl.BlockSpec((D, C_PAD), lambda i: (0, 0)),
            pl.BlockSpec((1, C_PAD), lambda i: (0, 0)),
        ],
        out_specs=pl.BlockSpec((tile_n, C_PAD), lambda i: (i, 0)),
        compiler_params=pltpu.CompilerParams(
            dimension_semantics=("parallel",),
            vmem_limit_bytes=48 * 1024 * 1024),
        cost_estimate=cost,
    )(x, w_pad, b_pad)

    # Drop padded class lanes; tiny slice + cast back to f32 for the API.
    return out[:, :n_classes].astype(jnp.float32)


if __name__ == "__main__":
    # Small shapes consistent with the module: im_size = (C, H, W), n_classes
    N, C, H, W = 2, 4, 16, 16
    n_classes = 10
    D = C * H * W

    key = jax.random.PRNGKey(0)
    k_img, k_w1, k_b1, k_w2, k_b2 = jax.random.split(key, 5)

    images = jax.random.normal(k_img, (N, C, H, W), dtype=jnp.float32)

    # Deterministic init mimicking nn.Linear default: U(-1/sqrt(in), 1/sqrt(in))
    bound1 = 1.0 / jnp.sqrt(jnp.float32(D))
    w1 = jax.random.uniform(k_w1, (n_classes, D), jnp.float32, -bound1, bound1)
    b1 = jax.random.uniform(k_b1, (n_classes,), jnp.float32, -bound1, bound1)
    bound2 = 1.0 / jnp.sqrt(jnp.float32(n_classes))
    w2 = jax.random.uniform(k_w2, (n_classes, n_classes), jnp.float32, -bound2, bound2)
    b2 = jax.random.uniform(k_b2, (n_classes,), jnp.float32, -bound2, bound2)

    # One-time weight prep (perm + fold + pad), then the streaming forward.
    w_pad, b_pad, nc = prepare_params(w1, b1, w2, b2, (C, H, W))
    scores = nn_forward(images, w_pad, b_pad, nc)
    jax.block_until_ready(scores)

    # pure-JAX reference of the PyTorch forward (f32 end to end)
    x_ref = jnp.transpose(images, (0, 2, 3, 1)).reshape(N, -1)
    y_ref = (x_ref @ w1.T + b1) @ w2.T + b2
    ref = jax.nn.softmax(y_ref, axis=1)

    assert scores.shape == (N, n_classes)
    assert jnp.allclose(jnp.sum(scores, axis=1), 1.0, atol=1e-2)
    assert jnp.allclose(scores, ref, atol=2e-2)
    print("KERNEL_OK")
</pallas_src>

<mosaic_0001>
module attributes {stable_mosaic.version = 11 : i64} {
  func.func @_nn_kernel(%arg0: i32, %arg1: memref<8x1024xf32, #tpu.memory_space<vmem>>, %arg2: memref<1024x128xbf16, #tpu.memory_space<vmem>>, %arg3: memref<1x128xf32, #tpu.memory_space<vmem>>, %arg4: memref<8x128xbf16, #tpu.memory_space<vmem>>) attributes {dimension_semantics = [#tpu.dimension_semantics<parallel>], iteration_bounds = array<i64: 1>, scalar_prefetch = 0 : i64, scratch_operands = 0 : i64, tpu.core_type = #tpu.core_type<tc>, window_params = [{transform_indices = @transform_0, window_bounds = array<i64: 8, 1024>}, {pipeline_mode = #tpu.pipeline_mode<synchronous>, transform_indices = @transform_1, window_bounds = array<i64: 1024, 128>}, {pipeline_mode = #tpu.pipeline_mode<synchronous>, transform_indices = @transform_2, window_bounds = array<i64: 1, 128>}, {transform_indices = @transform_3, window_bounds = array<i64: 8, 128>}]} {
    %c0 = arith.constant 0 : index
    %c0_0 = arith.constant 0 : index
    %0 = vector.load %arg1[%c0, %c0_0] : memref<8x1024xf32, #tpu.memory_space<vmem>>, vector<8x1024xf32>
    %1 = arith.truncf %0 : vector<8x1024xf32> to vector<8x1024xbf16>
    %c0_1 = arith.constant 0 : index
    %c0_2 = arith.constant 0 : index
    %2 = vector.load %arg2[%c0_1, %c0_2] : memref<1024x128xbf16, #tpu.memory_space<vmem>>, vector<1024x128xbf16>
    %cst = arith.constant dense<0.000000e+00> : vector<8x128xf32>
    %3 = tpu.matmul %1, %2, %cst {dimension_numbers = #tpu.dot_dimension_numbers<[1], [0], [0], [1], [0, 0, 1, 1], [], []>} : vector<8x1024xbf16>, vector<1024x128xbf16>, vector<8x128xf32> -> vector<8x128xf32>
    %c0_3 = arith.constant 0 : index
    %c0_4 = arith.constant 0 : index
    %4 = vector.load %arg3[%c0_3, %c0_4] : memref<1x128xf32, #tpu.memory_space<vmem>>, vector<1x128xf32>
    %5 = vector.broadcast %4 : vector<1x128xf32> to vector<8x128xf32>
    %6 = arith.addf %3, %5 : vector<8x128xf32>
    %cst_5 = arith.constant dense<0xFF800000> : vector<8xf32>
    %7 = vector.multi_reduction <maximumf>, %6, %cst_5 [1] : vector<8x128xf32> to vector<8xf32>
    %8 = vector.shape_cast %7 : vector<8xf32> to vector<8x1xf32>
    %9 = vector.broadcast %8 : vector<8x1xf32> to vector<8x128xf32>
    %10 = arith.subf %6, %9 : vector<8x128xf32>
    %11 = math.exp %10 : vector<8x128xf32>
    %cst_6 = arith.constant dense<0.000000e+00> : vector<8xf32>
    %12 = vector.multi_reduction <add>, %11, %cst_6 [1] : vector<8x128xf32> to vector<8xf32>
    %13 = vector.shape_cast %12 : vector<8xf32> to vector<8x1xf32>
    %14 = tpu.reciprocal %13 {approx = true} : vector<8x1xf32> -> vector<8x1xf32>
    %15 = vector.broadcast %14 : vector<8x1xf32> to vector<8x128xf32>
    %16 = arith.mulf %11, %15 : vector<8x128xf32>
    %17 = arith.truncf %16 : vector<8x128xf32> to vector<8x128xbf16>
    %c0_7 = arith.constant 0 : index
    %c0_8 = arith.constant 0 : index
    %18 = vector.load %arg4[%c0_7, %c0_8] : memref<8x128xbf16, #tpu.memory_space<vmem>>, vector<8x128xbf16>
    tpu.vector_store %arg4[%c0_7, %c0_8], %17 {strides = array<i32>} : memref<8x128xbf16, #tpu.memory_space<vmem>>, vector<8x128xbf16>,
    return
  }
  func.func @transform_0(%arg0: i32) -> (i32, i32) {
    %c0_i32 = arith.constant 0 : i32
    %c0_i32_0 = arith.constant 0 : i32
    return %arg0, %c0_i32 : i32, i32
  }
  func.func @transform_1(%arg0: i32) -> (i32, i32) {
    %c0_i32 = arith.constant 0 : i32
    %c0_i32_0 = arith.constant 0 : i32
    %c0_i32_1 = arith.constant 0 : i32
    return %c0_i32, %c0_i32_0 : i32, i32
  }
  func.func @transform_2(%arg0: i32) -> (i32, i32) {
    %c0_i32 = arith.constant 0 : i32
    %c0_i32_0 = arith.constant 0 : i32
    %c0_i32_1 = arith.constant 0 : i32
    return %c0_i32, %c0_i32_0 : i32, i32
  }
  func.func @transform_3(%arg0: i32) -> (i32, i32) {
    %c0_i32 = arith.constant 0 : i32
    %c0_i32_0 = arith.constant 0 : i32
    return %arg0, %c0_i32 : i32, i32
  }
}

</mosaic_0001>

<bundles_post_ra>
// kernel: tpu_custom_call.1
= control target key start
LH: loop header
LB: loop body
LE: loop exit
PB: predicated region body
PF: predicated region fallthrough
CT: control target
= control target key end

     0   :  { %8 = vsyncpa [#allocation3], 0  ;;  %s1291_s0 = inlined_call_operand.hbm [shape: f32[2,1024], index: 0, kind: input, shape index: {}]   ;;  %s1292_s1 = inlined_call_operand.hbm [shape: bf16[1024,128], index: 1, kind: input, shape index: {}]   ;;  %s1293_s2 = inlined_call_operand.vmem [shape: f32[1,128], index: 2, kind: input, shape index: {}]   ;;  %s1294_s3 = inlined_call_operand.hbm [shape: bf16[2,128], index: 3, kind: output, shape index: {}]  }
   0x1   :  { %9 = vsyncpa [#allocation6], 0 }
   0x2   :  { %10 = vsyncpa [#allocation4], 0 }
   0x3   :  { %15 = vsyncadd [#allocation3], 768  ;;  %s1205_s12 = smov [#allocation2]   ;;  %s1133_s16 = scalar_lea.hbm %s1291_s0, 256 }
   0x4   :  { %s16_s13 = sshll.u32 %s1205_s12, 4  ;;  %p1134_p0 = scmp.ne.s32.totalorder %s1291_s0, %s1133_s16  ;;  %s17_s13 = int_to_ptr.vmem [resolvable:$true] %s16_s13 }
   0x5   :  { %p1137_p1 = scmp.lt.u32.totalorder %s1133_s16, %s1291_s0 }
   0x7   :  { %p1139_p2 = pnand %p1137_p1, %p1134_p0 }
   0x9   :  { %1142 = shalt.err (!%p1139_p2)
}
   0xa   :  { %s1143_s21 = scalar_lea.vmem %s17_s13, 256  ;;  %s1147_s22 = scalar_lea.vmem %s17_s13, 1024 }
   0xb   :  { %p1144_p3 = scmp.ne.s32.totalorder %s17_s13, %s1143_s21  ;;  %p1148_p4 = scmp.lt.s32.totalorder %s17_s13, %s17_s13 }
   0xc   :  { %p1149_p5 = scmp.lt.s32.totalorder %s1147_s22, %s1143_s21 }
   0xe   :  { %p1150_p6 = por %p1149_p5, %p1148_p4 }
  0x10   :  { %p1151_p7 = pnand %p1150_p6, %p1144_p3 }
  0x12   :  { %1154 = shalt.err (!%p1151_p7)
}
  0x13   :  { %s1206_s23 = smov 256   ;;  %s1207_s24 = smov 16  }
  0x14   :  { %22 = dma.hbm_to_vmem [thread:$0]  %s1291_s0, 256, %s17_s13, [#allocation3], %s1206_s23, %s1206_s23, %s1207_s24  }
  0x15   :  { %s1208_s27 = smov [#allocation5]   ;;  %s1155_s4 = scalar_lea.hbm %s1292_s1, 8192 }
  0x16   :  { %s28_s28 = sshll.u32 %s1208_s27, 4  ;;  %p1156_p8 = scmp.ne.s32.totalorder %s1292_s1, %s1155_s4  ;;  %s29_s28 = int_to_ptr.vmem [resolvable:$true] %s28_s28 }
  0x17   :  { %p1159_p9 = scmp.lt.u32.totalorder %s1155_s4, %s1292_s1 }
  0x19   :  { %p1161_p10 = pnand %p1159_p9, %p1156_p8 }
  0x1b   :  { %1164 = shalt.err (!%p1161_p10)
}
  0x1c   :  { %s1165_s9 = scalar_lea.vmem %s29_s28, 8192  ;;  %p1170_p12 = scmp.lt.s32.totalorder %s29_s28, %s29_s28 }
  0x1d   :  { %p1166_p11 = scmp.ne.s32.totalorder %s29_s28, %s1165_s9  ;;  %p1171_p13 = scmp.lt.s32.totalorder %s1165_s9, %s1165_s9 }
  0x1f   :  { %p1172_p0 = por %p1171_p13, %p1170_p12 }
  0x21   :  { %p1173_p1 = pnand %p1172_p0, %p1166_p11 }
  0x23   :  { %1176 = shalt.err (!%p1173_p1)
}
  0x24   :  { %s1209_s0 = smov 64   ;;  %s1210_s10 = smov 4  }
  0x25   :  { %34 = dma.hbm_to_vmem [thread:$0]  %s1292_s1, 8192, %s29_s28, [#allocation6], %s1209_s0, %s1209_s0, %s1210_s10  }
  0x26   :  { %1199 = dma.done.wait [#allocation3], 1024  }
  0x27   :  { %1200 = vsyncadd [#allocation3], 4294966272 }
  0x28   :  { %1201 = dma.done.wait [#allocation6], 8192  }
  0x29   :  { %1202 = vsyncadd [#allocation6], 4294959104  ;;  %v1053_v0 = vld [vmem:[#allocation5 + $0x40] sm:$0xff]   ;;  %v1057_v4 = vld [vmem:[#allocation5 + $0x48] sm:$0xff]   ;;  %v1211_v24 = vmov 1983009808   ;;  %v67_v26 = vlaneseq }
  0x2a   :  { %v1054_v1 = vld [vmem:[#allocation5 + $0xc0] sm:$0xff]   ;;  %955 = vmatprep.subr.bf16.mxu0 %v1053_v0  ;;  %v1058_v5 = vld [vmem:[#allocation5 + $0xc8] sm:$0xff]   ;;  %v1061_v8 = vld [vmem:[#allocation5 + $0x50] sm:$0xff]   ;;  %v65_v25 = vunpack.c.l.s4 %v1211_v24 }
  0x2b   :  { %v1055_v2 = vld [vmem:[#allocation5] sm:$0xff]   ;;  %977 = vmatprep.subr.bf16.mxu1 %v1054_v1  ;;  %v1059_v6 = vld [vmem:[#allocation5 + $0x8] sm:$0xff]   ;;  %v1062_v9 = vld [vmem:[#allocation5 + $0xd0] sm:$0xff]   ;;  %v1260_v32 = vshrl.u32 %v67_v26, 7 }
  0x2c   :  { %v1056_v3 = vld [vmem:[#allocation5 + $0x80] sm:$0xff]   ;;  %956 = vmatpush3.bf16.msra.mxu0 %v1055_v2  ;;  %v1060_v7 = vld [vmem:[#allocation5 + $0x88] sm:$0xff]   ;;  %v1063_v10 = vld [vmem:[#allocation5 + $0x10] sm:$0xff]   ;;  %v66_v31 = vunpack.c.0.s8 %v65_v25 }
  0x2d   :  { %978 = vmatpush3.bf16.msra.mxu1 %v1056_v3  ;;  %957 = vmatprep.subr.bf16.mxu0 %v1057_v4  ;;  %v1064_v11 = vld [vmem:[#allocation5 + $0x90] sm:$0xff]   ;;  %v1065_v12 = vld [vmem:[#allocation5 + $0x58] sm:$0xff]   ;;  %v1069_v16 = vld [vmem:[#allocation5 + $0x60] sm:$0xff]  }
  0x2e   :  { %979 = vmatprep.subr.bf16.mxu1 %v1058_v5  ;;  %v1066_v13 = vld [vmem:[#allocation5 + $0xd8] sm:$0xff]   ;;  %v1070_v17 = vld [vmem:[#allocation5 + $0xe0] sm:$0xff]   ;;  %v1073_v20 = vld [vmem:[#allocation5 + $0x68] sm:$0xff]   ;;  %v1263_v37 = vsub.s32 %v66_v31, %v1260_v32 }
  0x2f   :  { %v1067_v14 = vld [vmem:[#allocation5 + $0x18] sm:$0xff]   ;;  %v1071_v18 = vld [vmem:[#allocation5 + $0x20] sm:$0xff]   ;;  %v1074_v21 = vld [vmem:[#allocation5 + $0xe8] sm:$0xff]  }
  0x30   :  { %958 = vmatpush3.bf16.msra.mxu0 %v1059_v6  ;;  %v1068_v15 = vld [vmem:[#allocation5 + $0x98] sm:$0xff]   ;;  %v1072_v19 = vld [vmem:[#allocation5 + $0xa0] sm:$0xff]   ;;  %v1075_v22 = vld [vmem:[#allocation5 + $0x28] sm:$0xff]  }
  0x31   :  { %980 = vmatpush3.bf16.msra.mxu1 %v1060_v7  ;;  %959 = vmatprep.subr.bf16.mxu0 %v1061_v8  ;;  %v1076_v23 = vld [vmem:[#allocation5 + $0xa8] sm:$0xff]   ;;  %v1077_v27 = vld [vmem:[#allocation5 + $0x70] sm:$0xff]   ;;  %v1081_v33 = vld [vmem:[#allocation5 + $0x78] sm:$0xff]  }
  0x32   :  { %981 = vmatprep.subr.bf16.mxu1 %v1062_v9  ;;  %v1078_v28 = vld [vmem:[#allocation5 + $0xf0] sm:$0xff]   ;;  %v1082_v34 = vld [vmem:[#allocation5 + $0xf8] sm:$0xff]   ;;  %v1091_v44 = vld [vmem:[#allocation5 + $0x140] sm:$0xff]  }
  0x33   :  { %v1079_v29 = vld [vmem:[#allocation5 + $0x30] sm:$0xff]   ;;  %v1083_v35 = vld [vmem:[#allocation5 + $0x38] sm:$0xff]   ;;  %v1092_v47 = vld [vmem:[#allocation5 + $0x1c0] sm:$0xff]  }
  0x34   :  { %960 = vmatpush3.bf16.msra.mxu0 %v1063_v10  ;;  %v1080_v30 = vld [vmem:[#allocation5 + $0xb0] sm:$0xff]   ;;  %v1084_v36 = vld [vmem:[#allocation5 + $0xb8] sm:$0xff]   ;;  %v1093_v50 = vld [vmem:[#allocation5 + $0x100] sm:$0xff]  }
  0x35   :  { %982 = vmatpush3.bf16.msra.mxu1 %v1064_v11  ;;  %961 = vmatprep.subr.bf16.mxu0 %v1065_v12  ;;  %v1085_v38 = vld [vmem:[#allocation2] ss:$16 sps:$4 sm:$0xff]   ;;  %v1089_v40 = vld [vmem:[#allocation2 + $0x4] ss:$16 sps:$4 sm:$0xff]   ;;  %v1095_v56 = vld [vmem:[#allocation5 + $0x148] sm:$0xff]  }
  0x36   :  { %983 = vmatprep.subr.bf16.mxu1 %v1066_v13  ;;  %v1087_v39 = vld [vmem:[#allocation2 + $0x20] ss:$16 sps:$4 sm:$0xff]   ;;  %v1090_v41 = vld [vmem:[#allocation2 + $0x24] ss:$16 sps:$4 sm:$0xff]   ;;  %v70_v42 = vrot.slane %v1085_v38, %v1263_v37  ;;  %v77_v45 = vrot.slane %v1089_v40, %v1263_v37  ;;  %v1096_v59 = vld [vmem:[#allocation5 + $0x1c8] sm:$0xff]  }
  0x37   :  { %v84_v43 = vrot.slane %v1087_v39, %v1263_v37  ;;  %v91_v46 = vrot.slane %v1090_v41, %v1263_v37  ;;  %v1094_v53 = vld [vmem:[#allocation5 + $0x180] sm:$0xff]   ;;  %v1097_v60 = vld [vmem:[#allocation5 + $0x108] sm:$0xff]   ;;  %v1099_v62 = vld [vmem:[#allocation5 + $0x150] sm:$0xff]  }
  0x38   :  { %962 = vmatpush3.bf16.msra.mxu0 %v1067_v14  ;;  %v1098_v61 = vld [vmem:[#allocation5 + $0x188] sm:$0xff]   ;;  %v1100_v63 = vld [vmem:[#allocation5 + $0x1d0] sm:$0xff]   ;;  %v1103_v2 = vld [vmem:[#allocation5 + $0x158] sm:$0xff]  }
  0x39   :  { %984 = vmatpush3.bf16.msra.mxu1 %v1068_v15  ;;  %963 = vmatprep.subr.bf16.mxu0 %v1069_v16  ;;  %v93_v48 = vcombine.high %v70_v42, %v84_v43  ;;  %v92_v49 = vcombine.low %v70_v42, %v84_v43  ;;  %v95_v51 = vcombine.high %v77_v45, %v91_v46  ;;  %v1101_v0 = vld [vmem:[#allocation5 + $0x110] sm:$0xff]   ;;  %v1104_v3 = vld [vmem:[#allocation5 + $0x1d8] sm:$0xff]   ;;  %v1107_v6 = vld [vmem:[#allocation5 + $0x160] sm:$0xff]  }
  0x3a   :  { %985 = vmatprep.subr.bf16.mxu1 %v1070_v17  ;;  %v94_v52 = vcombine.low %v77_v45, %v91_v46  ;;  %v1102_v1 = vld [vmem:[#allocation5 + $0x190] sm:$0xff]   ;;  %v1105_v4 = vld [vmem:[#allocation5 + $0x118] sm:$0xff]   ;;  %v1108_v7 = vld [vmem:[#allocation5 + $0x1e0] sm:$0xff]  }
  0x3b   :  { %v141_v54 = vpack.c.bf16 %v93_v48, %v93_v48  ;;  %v140_v55 = vpack.c.bf16 %v92_v49, %v92_v49  ;;  %v143_v57 = vpack.c.bf16 %v95_v51, %v95_v51  ;;  %v1106_v5 = vld [vmem:[#allocation5 + $0x198] sm:$0xff]   ;;  %v1109_v8 = vld [vmem:[#allocation5 + $0x120] sm:$0xff]   ;;  %v1111_v10 = vld [vmem:[#allocation5 + $0x168] sm:$0xff]  }
  0x3c   :  { %964 = vmatpush3.bf16.msra.mxu0 %v1071_v18  ;;  %v142_v58 = vpack.c.bf16 %v94_v52, %v94_v52  ;;  %v1110_v9 = vld [vmem:[#allocation5 + $0x1a0] sm:$0xff]   ;;  %v1112_v11 = vld [vmem:[#allocation5 + $0x1e8] sm:$0xff]   ;;  %v1115_v14 = vld [vmem:[#allocation5 + $0x170] sm:$0xff]  }
  0x3d   :  { %986 = vmatpush3.bf16.msra.mxu1 %v1072_v19  ;;  %965 = vmatprep.subr.bf16.mxu0 %v1073_v20  ;;  %v1113_v12 = vld [vmem:[#allocation5 + $0x128] sm:$0xff]   ;;  %v1116_v15 = vld [vmem:[#allocation5 + $0x1f0] sm:$0xff]   ;;  %v1119_v18 = vld [vmem:[#allocation5 + $0x178] sm:$0xff]  }
  0x3e   :  { %987 = vmatprep.subr.bf16.mxu1 %v1074_v21  ;;  %699 = vmatprep.mubr.bf16.mxu0 %v141_v54  ;;  %v1114_v13 = vld [vmem:[#allocation5 + $0x1a8] sm:$0xff]   ;;  %v1117_v16 = vld [vmem:[#allocation5 + $0x130] sm:$0xff]   ;;  %v1120_v19 = vld [vmem:[#allocation5 + $0x1f8] sm:$0xff]  }
  0x3f   :  { %739 = vmatprep.mubr.bf16.mxu1 %v143_v57  ;;  %v1118_v17 = vld [vmem:[#allocation5 + $0x1b0] sm:$0xff]   ;;  %v1121_v20 = vld [vmem:[#allocation5 + $0x138] sm:$0xff]   ;;  %v888_v42 = vld [vmem:[%s1293_s2] ss:$0 sm:$0xff] }
  0x40   :  { %966 = vmatpush3.bf16.msra.mxu0 %v1075_v22  ;;  %v1122_v21 = vld [vmem:[#allocation5 + $0x1b8] sm:$0xff]  }
  0x41   :  { %988 = vmatpush3.bf16.msra.mxu1 %v1076_v23  ;;  %967 = vmatprep.subr.bf16.mxu0 %v1077_v27  ;;  %v1123_v22 = vld [vmem:[#allocation2 + $0x8] ss:$16 sps:$4 sm:$0xff]   ;;  %v1127_v24 = vld [vmem:[#allocation2 + $0xc] ss:$16 sps:$4 sm:$0xff]  }
  0x42   :  { %989 = vmatprep.subr.bf16.mxu1 %v1078_v28  ;;  %v1125_v23 = vld [vmem:[#allocation2 + $0x28] ss:$16 sps:$4 sm:$0xff]   ;;  %v1128_v25 = vld [vmem:[#allocation2 + $0x2c] ss:$16 sps:$4 sm:$0xff]   ;;  %v106_v26 = vrot.slane %v1123_v22, %v1263_v37  ;;  %v113_v28 = vrot.slane %v1127_v24, %v1263_v37 }
  0x43   :  { %v120_v27 = vrot.slane %v1125_v23, %v1263_v37 }
  0x44   :  { %968 = vmatpush3.bf16.msra.mxu0 %v1079_v29  ;;  %v127_v29 = vrot.slane %v1128_v25, %v1263_v37 }
  0x45   :  { %990 = vmatpush3.bf16.msra.mxu1 %v1080_v30  ;;  %969 = vmatprep.subr.bf16.mxu0 %v1081_v33  ;;  %v129_v30 = vcombine.high %v106_v26, %v120_v27  ;;  %v128_v31 = vcombine.low %v106_v26, %v120_v27 }
  0x46   :  { %991 = vmatprep.subr.bf16.mxu1 %v1082_v34  ;;  %v131_v33 = vcombine.high %v113_v28, %v127_v29  ;;  %v130_v34 = vcombine.low %v113_v28, %v127_v29 }
  0x48   :  { %970 = vmatpush3.bf16.msra.mxu0 %v1083_v35  ;;  %v145_v35 = vpack.c.bf16 %v129_v30, %v129_v30  ;;  %v147_v38 = vpack.c.bf16 %v131_v33, %v131_v33  ;;  %v146_v39 = vpack.c.bf16 %v130_v34, %v130_v34 }
  0x49   :  { %992 = vmatpush3.bf16.msra.mxu1 %v1084_v36  ;;  %999 = vmatprep.subr.bf16.mxu0 %v1091_v44  ;;  %v144_v36 = vpack.c.bf16 %v128_v31, %v128_v31 }
  0x4a   :  { %1021 = vmatprep.subr.bf16.mxu1 %v1092_v47 }
  0x4b   :  { %700 = vmatmul.mubr.bf16.vlgmr.msra.gmra.mrb[0].mxu0 %v140_v55 }
  0x4c   :  { %740 = vmatmul.mubr.bf16.vlgmr.msra.gmra.mrb[0].mxu1 %v142_v58  ;;  %1000 = vmatpush3.bf16.msra.mxu0 %v1093_v50 }
  0x4d   :  { %1022 = vmatpush3.bf16.msra.mxu1 %v1094_v53  ;;  %1001 = vmatprep.subr.bf16.mxu0 %v1095_v56 }
  0x4e   :  { %1023 = vmatprep.subr.bf16.mxu1 %v1096_v59  ;;  %779 = vmatprep.mubr.bf16.mxu0 %v145_v35 }
  0x4f   :  { %819 = vmatprep.mubr.bf16.mxu1 %v147_v38 }
  0x50   :  { %1002 = vmatpush3.bf16.msra.mxu0 %v1097_v60 }
  0x51   :  { %1024 = vmatpush3.bf16.msra.mxu1 %v1098_v61  ;;  %1003 = vmatprep.subr.bf16.mxu0 %v1099_v62 }
  0x52   :  { %1025 = vmatprep.subr.bf16.mxu1 %v1100_v63 }
  0x54   :  { %1004 = vmatpush3.bf16.msra.mxu0 %v1101_v0 }
  0x55   :  { %1026 = vmatpush3.bf16.msra.mxu1 %v1102_v1  ;;  %1005 = vmatprep.subr.bf16.mxu0 %v1103_v2 }
  0x56   :  { %1027 = vmatprep.subr.bf16.mxu1 %v1104_v3 }
  0x58   :  { %1006 = vmatpush3.bf16.msra.mxu0 %v1105_v4 }
  0x59   :  { %1028 = vmatpush3.bf16.msra.mxu1 %v1106_v5  ;;  %1007 = vmatprep.subr.bf16.mxu0 %v1107_v6  ;;  %v1212_v5 = vmov 1966171168  }
  0x5a   :  { %1029 = vmatprep.subr.bf16.mxu1 %v1108_v7  ;;  %v839_v6 = vunpack.c.l.s4 %v1212_v5 }
  0x5c   :  { %1008 = vmatpush3.bf16.msra.mxu0 %v1109_v8  ;;  %v840_v7 = vunpack.c.0.s8 %v839_v6 }
  0x5d   :  { %1030 = vmatpush3.bf16.msra.mxu1 %v1110_v9  ;;  %1009 = vmatprep.subr.bf16.mxu0 %v1111_v10 }
  0x5e   :  { %1031 = vmatprep.subr.bf16.mxu1 %v1112_v11  ;;  %v843_v9 = vsub.s32 %v840_v7, %v1260_v32 }
  0x60   :  { %1010 = vmatpush3.bf16.msra.mxu0 %v1113_v12 }
  0x61   :  { %1032 = vmatpush3.bf16.msra.mxu1 %v1114_v13  ;;  %1011 = vmatprep.subr.bf16.mxu0 %v1115_v14 }
  0x62   :  { %1033 = vmatprep.subr.bf16.mxu1 %v1116_v15 }
  0x64   :  { %1012 = vmatpush3.bf16.msra.mxu0 %v1117_v16 }
  0x65   :  { %1034 = vmatpush3.bf16.msra.mxu1 %v1118_v17  ;;  %1013 = vmatprep.subr.bf16.mxu0 %v1119_v18 }
  0x66   :  { %1035 = vmatprep.subr.bf16.mxu1 %v1120_v19 }
  0x68   :  { %1014 = vmatpush3.bf16.msra.mxu0 %v1121_v20 }
  0x69   :  { %1036 = vmatpush3.bf16.msra.mxu1 %v1122_v21 }
  0x6b   :  { %780 = vmatmul.mubr.bf16.vlgmr.msra.gmra.mrb[4].mxu0 %v144_v36 }
  0x6c   :  { %820 = vmatmul.mubr.bf16.vlgmr.msra.gmra.mrb[4].mxu1 %v146_v39 }
 0x11e   :  { %v971_v40 = vpop.f32.mrb[0].mxu0 }
 0x11f   :  { %v993_v41 = vpop.f32.mrb[0].mxu1  ;;  %v972_v37 = vpop.f32.mrb[1].mxu0 }
 0x120   :  { %v973_v43 = vadd.f32 %v972_v37, %v971_v40  ;;  %v994_v44 = vpop.f32.mrb[1].mxu1  ;;  %v974_v45 = vpop.f32.mrb[2].mxu0 }
 0x121   :  { %v995_v46 = vadd.f32 %v994_v44, %v993_v41  ;;  %v996_v47 = vpop.f32.mrb[2].mxu1  ;;  %v975_v48 = vpop.f32.mrb[3].mxu0 }
 0x122   :  { %v702_v49 = vadd.f32 %v973_v43, %v888_v42  ;;  %v997_v50 = vpop.f32.mrb[3].mxu1 }
 0x124   :  { %v742_v51 = vadd.f32 %v995_v46, %v702_v49 }
 0x13e   :  { %v1015_v52 = vpop.f32.mrb[4].mxu0 }
 0x13f   :  { %v1037_v53 = vpop.f32.mrb[4].mxu1  ;;  %v1016_v54 = vpop.f32.mrb[5].mxu0 }
 0x140   :  { %v1017_v55 = vadd.f32 %v1016_v54, %v1015_v52  ;;  %v1038_v56 = vpop.f32.mrb[5].mxu1  ;;  %v1018_v57 = vpop.f32.mrb[6].mxu0 }
 0x141   :  { %v1039_v58 = vadd.f32 %v1038_v56, %v1037_v53  ;;  %v1040_v59 = vpop.f32.mrb[6].mxu1  ;;  %v1019_v60 = vpop.f32.mrb[7].mxu0 }
 0x142   :  { %v782_v61 = vadd.f32 %v1017_v55, %v742_v51  ;;  %v1041_v62 = vpop.f32.mrb[7].mxu1 }
 0x144   :  { %v822_v63 = vadd.f32 %v1039_v58, %v782_v61 }
 0x146   :  { %827 = vmax.xlane.f32.xlu0 %v822_v63 }
 0x1d3   :  { %v828_v0 = vpop.xlane.xlu0 %827 }
 0x1d4   :  { %v829_v1 = vsub.f32 %v822_v63, %v828_v0 }
 0x1d6   :  { %v830_v2 = vmul.f32 1.442695, %v829_v1 }
 0x1d8   :  { %1129 = vpow2.f32 %v830_v2 }
 0x1e2   :  { %v1130_v3 = vpop.eup %1129 }
 0x1e3   :  { %832 = vadd.xlane.f32.xlu0 %v1130_v3 }
 0x270   :  { %v833_v4 = vpop.xlane.xlu0 %832 }
 0x271   :  { %1131 = vrcp.f32 %v833_v4 }
 0x27b   :  { %v1132_v8 = vpop.eup %1131 }
 0x27c   :  { %v835_v10 = vmul.f32 %v1132_v8, %v1130_v3 }
 0x27e   :  { %v836_v11 = vpack.c.bf16 %v835_v10, %v835_v10 }
 0x280   :  { %v844_v12 = vrot.slane %v836_v11, %v843_v9 }
 0x282   :  { %v845_v13 = vcombine.high %v844_v12, %v844_v12  ;;  %v852_v14 = vrot.slane %v844_v12, %v843_v9  ;;  %953 = vst.sshfl [vmem:[#allocation7] sm:$0x1 pattern:$0x73625140] %v844_v12 }
 0x284   :  { %v859_v15 = vrot.slane %v845_v13, %v843_v9  ;;  %v860_v16 = vcombine.high %v852_v14, %v852_v14  ;;  %954 = vst.sshfl [vmem:[#allocation7 + $0x1] sm:$0x1 pattern:$0x73625140] %v845_v13 }
 0x286   :  { %v861_v17 = vcombine.high %v859_v15, %v859_v15  ;;  %868 = vst [vmem:[#allocation7 + $0x2] sm:$0x1] %v860_v16 }
 0x288   :  { %869 = vst [vmem:[#allocation7 + $0x3] sm:$0x1] %v861_v17 }
 0x289   :  { %874 = vsyncadd [#allocation4], 48  ;;  %s1213_s2 = smov [#allocation7]  }
 0x28a   :  { %s875_s14 = sshll.u32 %s1213_s2, 4  ;;  %s876_s14 = int_to_ptr.vmem [resolvable:$true] %s875_s14 }
 0x28b   :  { %s1177_s15 = scalar_lea.vmem %s876_s14, 16  ;;  %s1181_s16 = scalar_lea.vmem %s876_s14, 64 }
 0x28c   :  { %p1178_p2 = scmp.ne.s32.totalorder %s876_s14, %s1177_s15  ;;  %p1182_p3 = scmp.lt.s32.totalorder %s876_s14, %s876_s14 }
 0x28d   :  { %p1183_p4 = scmp.lt.s32.totalorder %s1181_s16, %s1177_s15 }
 0x28f   :  { %p1184_p5 = por %p1183_p4, %p1182_p3 }
 0x291   :  { %p1185_p6 = pnand %p1184_p5, %p1178_p2 }
 0x293   :  { %1188 = shalt.err (!%p1185_p6)
}
 0x294   :  { %s1189_s19 = scalar_lea.hbm %s1294_s3, 16 }
 0x295   :  { %p1190_p7 = scmp.ne.s32.totalorder %s1294_s3, %s1189_s19  ;;  %p1193_p8 = scmp.lt.u32.totalorder %s1189_s19, %s1294_s3 }
 0x297   :  { %p1195_p9 = pnand %p1193_p8, %p1190_p7 }
 0x299   :  { %1198 = shalt.err (!%p1195_p9)
}
 0x29a   :  { %s1214_s25 = smov 1  }
 0x29b   :  { %881 = dma.vmem_to_hbm [thread:$0]  %s876_s14, 16, %s1294_s3, [#allocation4], %s1207_s24, %s1207_s24, %s1214_s25  }
 0x29c   :  { %1203 = dma.done.wait [#allocation4], 64  }
 0x29d   :  { %1204 = vsyncadd [#allocation4], 4294967232 }
 0x29e   :  { %885 = vsyncpa [#allocation3], 1 }
 0x29f   :  { %886 = vsyncpa [#allocation6], 1 }
 0x2a0   :  { %887 = vsyncpa [#allocation4], 1 }

</bundles_post_ra>
